<compile_context>
chip_gen: v6e
topology: v6e:2x2x1
jax: 0.10.0
libtpu: 0.0.40
codegen_flags: <defaults>
</compile_context>

<pallas_src>
from copy import copy

import jax
import jax.numpy as jnp
from jax import lax
from jax.experimental import pallas as pl
from jax.experimental.pallas import tpu as pltpu


LANE = 128
GROUP = 8                    # (SUB,128) chunks processed per inner-loop slab
MAX_CHUNKS_PER_BLOCK = 512   # 512 native chunks per grid step = 2 MiB / input


def _sublane(dtype) -> int:
    """Native sublane tiling: 8 rows for 4-byte, 16 for 2-byte, 32 for 1-byte."""
    return {4: 8, 2: 16, 1: 32}.get(jnp.dtype(dtype).itemsize, 8)


def _cdiv(a: int, b: int) -> int:
    return -(-a // b)


def _round_up(a: int, b: int) -> int:
    return _cdiv(a, b) * b


# ----------------------------------------------------------------------------
# Pallas kernel: one streaming pass computing sum(|pred-gt|) and sum((pred-gt)^2)
# ----------------------------------------------------------------------------
def _make_loss_sums_kernel(chunks_per_block, steps, total_chunks, needs_mask):
    """Grid = (cores, steps). Each step streams `chunks_per_block` (SUB,128)
    chunks of both inputs and accumulates per-core partial sums of |d| and d^2
    into lane-dense (1,SUB,128) f32 output blocks that stay VMEM-resident
    across the (arbitrary) reduction axis."""
    n_groups = chunks_per_block // GROUP
    rem = chunks_per_block - n_groups * GROUP
    unroll = max(1, min(4, n_groups))

    def kernel(pred_ref, gt_ref, l1_ref, l2_ref):
        c = pl.program_id(0)
        i = pl.program_id(1)

        @pl.when(i == 0)
        def _():
            l1_ref[...] = jnp.zeros_like(l1_ref)
            l2_ref[...] = jnp.zeros_like(l2_ref)

        # Global chunk offset of this grid step (for tail/phantom masking).
        block_chunk0 = (c * steps + i) * chunks_per_block

        def accum(offset, size, carry):
            l1_acc, l2_acc = carry
            sl = pl.ds(offset, size)
            # Native-dtype loads; upcast in-register.  The diff/abs/square
            # temporaries are only (size, SUB, LANE) -> stay vreg-resident.
            d = pred_ref[sl].astype(jnp.float32) - gt_ref[sl].astype(jnp.float32)
            if needs_mask:
                ids = (block_chunk0 + offset
                       + lax.broadcasted_iota(jnp.int32, d.shape, 0))
                d = jnp.where(ids < total_chunks, d, 0.0)
            l1_acc = l1_acc + jnp.sum(jnp.abs(d), axis=0)
            l2_acc = l2_acc + jnp.sum(d * d, axis=0)
            return l1_acc, l2_acc

        zero = jnp.zeros(l1_ref.shape[1:], jnp.float32)  # (SUB, LANE)
        carry = (zero, zero)
        if n_groups > 0:
            def body(g, carry):
                off = pl.multiple_of(g * GROUP, GROUP)
                return accum(off, GROUP, carry)
            carry = lax.fori_loop(0, n_groups, body, carry, unroll=unroll)
        if rem:
            carry = accum(n_groups * GROUP, rem, carry)

        l1_acc, l2_acc = carry
        l1_ref[...] += l1_acc[None]
        l2_ref[...] += l2_acc[None]

    return kernel


def _loss_sums_fwd_impl(pred, gt):
    """sum(|pred-gt|), sum((pred-gt)^2) as f32 device scalars (one HBM pass)."""
    # Shared chunking for (possibly) mixed dtypes: use the coarser native
    # sublane count so both blocks respect their layout tiling.
    sub = max(_sublane(pred.dtype), _sublane(gt.dtype))
    chunk_elems = sub * LANE
    numel = pred.size

    p = pred.reshape(-1)
    g = gt.reshape(-1)

    total_chunks = max(1, _cdiv(numel, chunk_elems))
    elem_pad = total_chunks * chunk_elems - numel
    if elem_pad:
        # Element-level ragged tail (< one chunk).  Identical zero padding of
        # both operands -> diff is exactly 0 there, contributes nothing.
        # TODO(synk): this still costs one XLA pad pass over the operands;
        # block-level raggedness is already handled in-kernel via masking.
        p = jnp.pad(p, (0, elem_pad))
        g = jnp.pad(g, (0, elem_pad))

    p3 = p.reshape(total_chunks, sub, LANE)
    g3 = g.reshape(total_chunks, sub, LANE)

    chunks_per_block = min(MAX_CHUNKS_PER_BLOCK, total_chunks)
    nblocks = _cdiv(total_chunks, chunks_per_block)
    # Always take the 2-way core split when there is more than one block so
    # v7x never serializes onto a single TensorCore (harmless outer loop on
    # 1-TC chips).  Odd block counts get one phantom block that is clamped in
    # the index_map and fully masked in-kernel.
    ncores = 2 if nblocks >= 2 else 1
    nblocks_padded = _round_up(nblocks, ncores)
    steps = nblocks_padded // ncores
    needs_mask = nblocks_padded * chunks_per_block > total_chunks

    last_block = nblocks - 1

    def in_map(c, i):
        b = c * steps + i
        return (jnp.minimum(b, last_block), 0, 0)   # clamp phantom blocks

    def out_map(c, i):
        return (c, 0, 0)

    kernel = _make_loss_sums_kernel(chunks_per_block, steps, total_chunks,
                                    needs_mask)

    l1_part, l2_part = pl.pallas_call(
        kernel,
        out_shape=(
            jax.ShapeDtypeStruct((ncores, sub, LANE), jnp.float32),
            jax.ShapeDtypeStruct((ncores, sub, LANE), jnp.float32),
        ),
        grid_spec=pltpu.PrefetchScalarGridSpec(
            num_scalar_prefetch=0,
            grid=(ncores, steps),
            in_specs=[
                pl.BlockSpec((chunks_per_block, sub, LANE), in_map),
                pl.BlockSpec((chunks_per_block, sub, LANE), in_map),
            ],
            out_specs=[
                pl.BlockSpec((1, sub, LANE), out_map),
                pl.BlockSpec((1, sub, LANE), out_map),
            ],
        ),
        compiler_params=pltpu.CompilerParams(
            dimension_semantics=("parallel", "arbitrary"),
            # 2 inputs x 2 pipeline buffers x 2 MiB ≈ 8 MiB + outputs; give
            # comfortable headroom (still well under v7x's 64 MiB physical).
            vmem_limit_bytes=32 * 1024 * 1024,
        ),
    )(p3, g3)

    # Tiny cross-lane reductions, once, outside the streaming kernel.
    return jnp.sum(l1_part), jnp.sum(l2_part)
    # TODO(synk): optionally fold this final reduce into the last grid step
    # (SMEM scalar outputs) to drop two tiny trailing XLA ops.


# custom_vjp so jax.grad works through the loss (dust3r uses it for training).
@jax.custom_vjp
def _loss_sums_pallas(pred, gt):
    return _loss_sums_fwd_impl(pred, gt)


def _loss_sums_vjp_fwd(pred, gt):
    return _loss_sums_fwd_impl(pred, gt), (pred, gt)


def _loss_sums_vjp_bwd(res, cots):
    pred, gt = res
    g1, g2 = cots
    d = pred.astype(jnp.float32) - gt.astype(jnp.float32)
    # d(sum|d|)/dpred = sign(d);  d(sum d^2)/dpred = 2*d;  dgt = -dpred.
    gpred = g1 * jnp.sign(d) + (2.0 * g2) * d
    # TODO(synk): fuse the backward into a second streaming Pallas kernel.
    return gpred.astype(pred.dtype), (-gpred).astype(gt.dtype)


_loss_sums_pallas.defvjp(_loss_sums_vjp_fwd, _loss_sums_vjp_bwd)

_loss_sums_impl = jax.jit(_loss_sums_pallas)


# Memo shared between chained sub-losses, scoped to ONE outermost forward()
# call only (set/cleared by MultiLoss.forward), so it never retains tracers or
# arrays across traces.  Lets L1Loss + 0.1*L2Loss stream the data once.
_ACTIVE_MEMO = None


def _loss_sums(pred, gt):
    """Returns (sum |pred-gt|, sum (pred-gt)^2, numel), computed in Pallas."""
    assert pred.shape == gt.shape
    key = (id(pred), id(gt))
    memo = _ACTIVE_MEMO
    if memo is not None and key in memo:
        return memo[key]
    l1, l2 = _loss_sums_impl(pred, gt)
    res = (l1, l2, pred.size)
    if memo is not None:
        memo[key] = res
    return res


# ----------------------------------------------------------------------------
# MultiLoss combinator (same semantics as the PyTorch module)
# ----------------------------------------------------------------------------
class MultiLoss:
    """loss = MyLoss1() + 0.1 * MyLoss2(); forward returns (loss, details)."""

    def __init__(self):
        self._alpha = 1
        self._loss2 = None

    def compute_loss(self, *args, **kwargs):
        raise NotImplementedError()

    def get_name(self):
        raise NotImplementedError()

    def __mul__(self, alpha):
        assert isinstance(alpha, (int, float))
        res = copy(self)
        res._alpha = alpha
        return res

    __rmul__ = __mul__

    def __add__(self, loss2):
        assert isinstance(loss2, MultiLoss)
        res = cur = copy(self)
        while cur._loss2 is not None:
            cur = cur._loss2
        cur._loss2 = loss2
        return res

    def __repr__(self):
        name = self.get_name()
        if self._alpha != 1:
            name = f"{self._alpha:g}*{name}"
        if self._loss2:
            name = f"{name} + {self._loss2}"
        return name

    def forward(self, *args, **kwargs):
        global _ACTIVE_MEMO
        owns_memo = _ACTIVE_MEMO is None
        if owns_memo:
            _ACTIVE_MEMO = {}
        try:
            loss = self.compute_loss(*args, **kwargs)
            if isinstance(loss, tuple):
                loss, details = loss
            elif loss.ndim == 0:
                # Keep the device scalar (no blocking float() host sync);
                # callers can cast lazily after the step completes.
                details = {self.get_name(): loss}
            else:
                details = {}
            loss = loss * self._alpha
            if self._loss2:
                loss2, details2 = self._loss2(*args, **kwargs)
                loss = loss + loss2
                details |= details2
            return (loss, details)
        finally:
            if owns_memo:
                _ACTIVE_MEMO = None

    __call__ = forward


# Concrete sub-losses whose hot path (elementwise + reduction) runs in Pallas.
class L1Loss(MultiLoss):
    def get_name(self):
        return "L1Loss"

    def compute_loss(self, pred, gt):
        s_abs, _, n = _loss_sums(pred, gt)
        return s_abs / n  # mean |pred - gt|, scalar


class L2Loss(MultiLoss):
    def get_name(self):
        return "L2Loss"

    def compute_loss(self, pred, gt):
        _, s_sq, n = _loss_sums(pred, gt)
        return s_sq / n  # mean (pred - gt)^2, scalar


# ----------------------------------------------------------------------------
if __name__ == "__main__":
    key = jax.random.PRNGKey(0)
    k1, k2, k3, k4 = jax.random.split(key, 4)

    # --- main small example (NCHW) --------------------------------------
    B, C, H, W = 2, 4, 16, 16
    pred = jax.random.normal(k1, (B, C, H, W), dtype=jnp.float32)
    gt = jax.random.normal(k2, (B, C, H, W), dtype=jnp.float32)

    criterion = L1Loss() + 0.1 * L2Loss()

    total, details = criterion(pred, gt)
    total = jax.block_until_ready(total)

    d = pred - gt
    ref = jnp.mean(jnp.abs(d)) + 0.1 * jnp.mean(d * d)
    assert jnp.allclose(total, ref, rtol=1e-5, atol=1e-5), (total, ref)
    assert set(details.keys()) == {"L1Loss", "L2Loss"}
    _ = {k: float(v) for k, v in details.items()}  # details still castable

    # --- gradient check (custom_vjp path) -------------------------------
    g_kernel = jax.grad(lambda p: criterion(p, gt)[0])(pred)
    g_ref = jax.grad(
        lambda p: jnp.mean(jnp.abs(p - gt)) + 0.1 * jnp.mean((p - gt) ** 2)
    )(pred)
    g_kernel = jax.block_until_ready(g_kernel)
    assert jnp.allclose(g_kernel, g_ref, rtol=1e-4, atol=1e-5)

    # --- ragged / multi-block / mixed-dtype stress check -----------------
    # (odd block count -> phantom block + 2-core split + in-kernel masking)
    pred2 = jax.random.normal(k3, (4, 5, 365, 367), dtype=jnp.float32)
    gt2 = jax.random.normal(k4, (4, 5, 365, 367), dtype=jnp.float32).astype(
        jnp.bfloat16)
    total2, _ = criterion(pred2, gt2)
    total2 = jax.block_until_ready(total2)
    d2 = pred2 - gt2.astype(jnp.float32)
    ref2 = jnp.mean(jnp.abs(d2)) + 0.1 * jnp.mean(d2 * d2)
    assert jnp.allclose(total2, ref2, rtol=1e-4, atol=1e-5), (total2, ref2)

    print("KERNEL_OK")
</pallas_src>

<mosaic_0001>
module attributes {stable_mosaic.version = 11 : i64} {
  func.func @kernel(%arg0: i32, %arg1: i32, %arg2: memref<2x8x128xf32, #tpu.memory_space<vmem>>, %arg3: memref<2x8x128xf32, #tpu.memory_space<vmem>>, %arg4: memref<1x8x128xf32, #tpu.memory_space<vmem>>, %arg5: memref<1x8x128xf32, #tpu.memory_space<vmem>>) attributes {dimension_semantics = [#tpu.dimension_semantics<parallel>, #tpu.dimension_semantics<arbitrary>], iteration_bounds = array<i64: 1, 1>, scalar_prefetch = 0 : i64, scratch_operands = 0 : i64, tpu.core_type = #tpu.core_type<tc>, window_params = [{transform_indices = @transform_0, window_bounds = array<i64: 2, 8, 128>}, {transform_indices = @transform_1, window_bounds = array<i64: 2, 8, 128>}, {transform_indices = @transform_2, window_bounds = array<i64: 1, 8, 128>}, {transform_indices = @transform_3, window_bounds = array<i64: 1, 8, 128>}]} {
    %c0_i32 = arith.constant 0 : i32
    %0 = arith.cmpi eq, %arg1, %c0_i32 : i32
    %1 = arith.extui %0 : i1 to i32
    %c0_i32_0 = arith.constant 0 : i32
    %2 = arith.cmpi ne, %1, %c0_i32_0 : i32
    scf.if %2 {
      %cst_20 = arith.constant 0.000000e+00 : f32
      %21 = vector.broadcast %cst_20 : f32 to vector<1x8x128xf32>
      %c0_21 = arith.constant 0 : index
      %c0_22 = arith.constant 0 : index
      %c0_23 = arith.constant 0 : index
      %22 = vector.load %arg4[%c0_21, %c0_22, %c0_23] : memref<1x8x128xf32, #tpu.memory_space<vmem>>, vector<1x8x128xf32>
      tpu.vector_store %arg4[%c0_21, %c0_22, %c0_23], %21 {strides = array<i32>} : memref<1x8x128xf32, #tpu.memory_space<vmem>>, vector<1x8x128xf32>,
      %cst_24 = arith.constant 0.000000e+00 : f32
      %23 = vector.broadcast %cst_24 : f32 to vector<1x8x128xf32>
      %c0_25 = arith.constant 0 : index
      %c0_26 = arith.constant 0 : index
      %c0_27 = arith.constant 0 : index
      %24 = vector.load %arg5[%c0_25, %c0_26, %c0_27] : memref<1x8x128xf32, #tpu.memory_space<vmem>>, vector<1x8x128xf32>
      tpu.vector_store %arg5[%c0_25, %c0_26, %c0_27], %23 {strides = array<i32>} : memref<1x8x128xf32, #tpu.memory_space<vmem>>, vector<1x8x128xf32>,
    } else {
    }
    %cst = arith.constant 0.000000e+00 : f32
    %3 = vector.broadcast %cst : f32 to vector<8x128xf32>
    %c0 = arith.constant 0 : index
    %c0_1 = arith.constant 0 : index
    %c0_2 = arith.constant 0 : index
    %4 = vector.load %arg2[%c0, %c0_1, %c0_2] : memref<2x8x128xf32, #tpu.memory_space<vmem>>, vector<2x8x128xf32>
    %c0_3 = arith.constant 0 : index
    %c0_4 = arith.constant 0 : index
    %c0_5 = arith.constant 0 : index
    %5 = vector.load %arg3[%c0_3, %c0_4, %c0_5] : memref<2x8x128xf32, #tpu.memory_space<vmem>>, vector<2x8x128xf32>
    %6 = arith.subf %4, %5 : vector<2x8x128xf32>
    %7 = math.absf %6 : vector<2x8x128xf32>
    %cst_6 = arith.constant dense<0.000000e+00> : vector<8x128xf32>
    %8 = vector.multi_reduction <add>, %7, %cst_6 [0] : vector<2x8x128xf32> to vector<8x128xf32>
    %9 = arith.addf %3, %8 : vector<8x128xf32>
    %10 = arith.mulf %6, %6 : vector<2x8x128xf32>
    %cst_7 = arith.constant dense<0.000000e+00> : vector<8x128xf32>
    %11 = vector.multi_reduction <add>, %10, %cst_7 [0] : vector<2x8x128xf32> to vector<8x128xf32>
    %12 = arith.addf %3, %11 : vector<8x128xf32>
    %c0_8 = arith.constant 0 : index
    %c0_9 = arith.constant 0 : index
    %c0_10 = arith.constant 0 : index
    %13 = vector.load %arg4[%c0_8, %c0_9, %c0_10] : memref<1x8x128xf32, #tpu.memory_space<vmem>>, vector<1x8x128xf32>
    %14 = vector.shape_cast %9 : vector<8x128xf32> to vector<1x8x128xf32>
    %15 = arith.addf %13, %14 : vector<1x8x128xf32>
    %c0_11 = arith.constant 0 : index
    %c0_12 = arith.constant 0 : index
    %c0_13 = arith.constant 0 : index
    %16 = vector.load %arg4[%c0_11, %c0_12, %c0_13] : memref<1x8x128xf32, #tpu.memory_space<vmem>>, vector<1x8x128xf32>
    tpu.vector_store %arg4[%c0_11, %c0_12, %c0_13], %15 {strides = array<i32>} : memref<1x8x128xf32, #tpu.memory_space<vmem>>, vector<1x8x128xf32>,
    %c0_14 = arith.constant 0 : index
    %c0_15 = arith.constant 0 : index
    %c0_16 = arith.constant 0 : index
    %17 = vector.load %arg5[%c0_14, %c0_15, %c0_16] : memref<1x8x128xf32, #tpu.memory_space<vmem>>, vector<1x8x128xf32>
    %18 = vector.shape_cast %12 : vector<8x128xf32> to vector<1x8x128xf32>
    %19 = arith.addf %17, %18 : vector<1x8x128xf32>
    %c0_17 = arith.constant 0 : index
    %c0_18 = arith.constant 0 : index
    %c0_19 = arith.constant 0 : index
    %20 = vector.load %arg5[%c0_17, %c0_18, %c0_19] : memref<1x8x128xf32, #tpu.memory_space<vmem>>, vector<1x8x128xf32>
    tpu.vector_store %arg5[%c0_17, %c0_18, %c0_19], %19 {strides = array<i32>} : memref<1x8x128xf32, #tpu.memory_space<vmem>>, vector<1x8x128xf32>,
    return
  }
  func.func @transform_0(%arg0: i32, %arg1: i32) -> (i32, i32, i32) {
    %c1_i32 = arith.constant 1 : i32
    %0 = arith.muli %arg0, %c1_i32 : i32
    %1 = arith.addi %0, %arg1 : i32
    %c0_i32 = arith.constant 0 : i32
    %2 = arith.minsi %1, %c0_i32 : i32
    %c0_i32_0 = arith.constant 0 : i32
    %c0_i32_1 = arith.constant 0 : i32
    %c0_i32_2 = arith.constant 0 : i32
    return %2, %c0_i32_0, %c0_i32_1 : i32, i32, i32
  }
  func.func @transform_1(%arg0: i32, %arg1: i32) -> (i32, i32, i32) {
    %c1_i32 = arith.constant 1 : i32
    %0 = arith.muli %arg0, %c1_i32 : i32
    %1 = arith.addi %0, %arg1 : i32
    %c0_i32 = arith.constant 0 : i32
    %2 = arith.minsi %1, %c0_i32 : i32
    %c0_i32_0 = arith.constant 0 : i32
    %c0_i32_1 = arith.constant 0 : i32
    %c0_i32_2 = arith.constant 0 : i32
    return %2, %c0_i32_0, %c0_i32_1 : i32, i32, i32
  }
  func.func @transform_2(%arg0: i32, %arg1: i32) -> (i32, i32, i32) {
    %c0_i32 = arith.constant 0 : i32
    %c0_i32_0 = arith.constant 0 : i32
    %c0_i32_1 = arith.constant 0 : i32
    return %arg0, %c0_i32, %c0_i32_0 : i32, i32, i32
  }
  func.func @transform_3(%arg0: i32, %arg1: i32) -> (i32, i32, i32) {
    %c0_i32 = arith.constant 0 : i32
    %c0_i32_0 = arith.constant 0 : i32
    %c0_i32_1 = arith.constant 0 : i32
    return %arg0, %c0_i32, %c0_i32_0 : i32, i32, i32
  }
}

</mosaic_0001>

<bundles_post_ra>
// kernel: _loss_sums_pallas.1
= control target key start
LH: loop header
LB: loop body
LE: loop exit
PB: predicated region body
PF: predicated region fallthrough
CT: control target
= control target key end

     0   :  { %s162_s0 = inlined_call_operand.vmem [shape: f32[2,8,128], index: 0, kind: input, shape index: {}]   ;;  %s163_s1 = inlined_call_operand.vmem [shape: f32[2,8,128], index: 1, kind: input, shape index: {}]   ;;  %s164_s2 = inlined_call_operand.vmem [shape: f32[1,8,128], index: 2, kind: output, shape index: {0}]   ;;  %s165_s3 = inlined_call_operand.vmem [shape: f32[1,8,128], index: 3, kind: output, shape index: {1}]  }
   0x1   :  { %v83_v0 = vld [vmem:[%s162_s0] sm:$0xff]  ;;  %v84_v1 = vld [vmem:[%s162_s0 + $0x8] sm:$0xff] }
   0x2   :  { %v85_v2 = vld [vmem:[%s163_s1] sm:$0xff]  ;;  %v86_v3 = vld [vmem:[%s163_s1 + $0x8] sm:$0xff] }
   0x3   :  { %v87_v4 = vsub.f32 %v83_v0, %v85_v2  ;;  %v88_v5 = vsub.f32 %v84_v1, %v86_v3 }
   0x5   :  { %v89_v6 = vand.u32 2147483647, %v87_v4  ;;  %v93_v7 = vmul.f32 %v87_v4, %v87_v4  ;;  %v90_v8 = vand.u32 2147483647, %v88_v5  ;;  %v94_v9 = vmul.f32 %v88_v5, %v88_v5 }
   0x7   :  { %v91_v10 = vadd.f32 %v90_v8, %v89_v6  ;;  %v95_v11 = vadd.f32 %v94_v9, %v93_v7 }
   0x9   :  { %99 = vst [vmem:[%s164_s2] sm:$0xff] %v91_v10  ;;  %102 = vst [vmem:[%s165_s3] sm:$0xff] %v95_v11 }

</bundles_post_ra>
